<compile_context>
chip_gen: v5e
topology: v5e:2x2
jax: 0.10.0
libtpu: 0.0.40
codegen_flags: <defaults>
</compile_context>

<pallas_src>
import functools
import math

import numpy as np
import jax
import jax.numpy as jnp
from jax import lax
from jax.experimental import pallas as pl
from jax.experimental.pallas import tpu as pltpu


# --------------------------------------------------------------------------
# Per-generation configuration
# --------------------------------------------------------------------------
def _device_kind():
    try:
        return jax.devices()[0].device_kind.lower()
    except Exception:
        return ""


_KIND = _device_kind()
_IS_V7X = "v7" in _KIND
_NUM_TC = 2 if _IS_V7X else 1
# v7x: 64 MiB physical VMEM per TensorCore -> keep headroom at 48 MiB.
# v5e/v6e: 128 MiB physical (v5e's default scoped limit is only 16 MiB, so an
# explicit limit is mandatory there) -> allow larger resident tiles.
_VMEM_LIMIT = (48 if _IS_V7X else 100) * 1024 * 1024

_VMEM = pl.BlockSpec(memory_space=pltpu.MemorySpace.VMEM)
_MASK_NEG = -1e30
_BF16 = jnp.bfloat16


def _head_block(H):
    # v7x: split heads across the two TensorCores via the parallel grid axis.
    # v5e/v6e (single TC): keep ALL heads in one grid step so the [N,E]/[N,N]
    # operands are DMA'd once and the MXU sees batched per-head work.
    if _NUM_TC >= 2 and H > 1 and H % _NUM_TC == 0:
        return H // _NUM_TC
    return H


def _vmem_call(kernel, out_shape, n_in):
    """Un-gridded pallas_call with whole (toy-sized) arrays resident in VMEM."""
    return pl.pallas_call(
        kernel,
        out_shape=out_shape,
        in_specs=[_VMEM] * n_in,
        out_specs=_VMEM,
        compiler_params=pltpu.CompilerParams(vmem_limit_bytes=_VMEM_LIMIT),
    )


# --------------------------------------------------------------------------
# Kernel 1: fused node projection  x @ [Wq | Wk | Wv | Wskip] + [bq|bk|bv|bs]
#   single matmul, four separate outputs (no unaligned slicing in the wrapper)
# --------------------------------------------------------------------------
def _fused_proj_kernel(x_ref, w_ref, b_ref, oq_ref, ok_ref, ov_ref, os_ref):
    proj = (jnp.dot(x_ref[...].astype(_BF16), w_ref[...].astype(_BF16),
                    preferred_element_type=jnp.float32) + b_ref[...])   # [N, 4*HC]
    hc = oq_ref.shape[-1]
    oq_ref[...] = proj[:, 0 * hc:1 * hc]
    ok_ref[...] = proj[:, 1 * hc:2 * hc]
    ov_ref[...] = proj[:, 2 * hc:3 * hc]
    os_ref[...] = proj[:, 3 * hc:4 * hc]


def fused_projection(x, w_cat, b_cat, hc):
    n = x.shape[0]
    out = jax.ShapeDtypeStruct((n, hc), jnp.float32)
    return pl.pallas_call(
        _fused_proj_kernel,
        out_shape=(out, out, out, out),
        in_specs=[_VMEM, _VMEM, _VMEM],
        out_specs=(_VMEM, _VMEM, _VMEM, _VMEM),
        compiler_params=pltpu.CompilerParams(vmem_limit_bytes=_VMEM_LIMIT),
    )(x, w_cat, b_cat)


# --------------------------------------------------------------------------
# Kernel 2: local MPNN attention (TransformerConv message passing)
#   gridded over head-blocks; edge features handled via incidence matmuls;
#   head-independent adjacency mask is precomputed and kept resident.
# --------------------------------------------------------------------------
def _graph_attn_kernel(q_ref, k_ref, v_ref, ea_ref, we_ref, adj_ref,
                       dinc_ref, sinc_ref, o_ref, *, scale):
    hb, n, c = q_ref.shape
    e_cnt = dinc_ref.shape[1]

    # pre-scale q: covers both the q.k and q.e score terms with O(N*C) VPU work
    q = (q_ref[...] * scale).astype(_BF16)              # [Hb, N, C]
    k = k_ref[...].astype(_BF16)
    v = v_ref[...].astype(_BF16)
    dinc = dinc_ref[...]                                 # [N, E] bf16 0/1
    sinc = sinc_ref[...]                                 # [N, E] bf16 0/1
    valid = adj_ref[...] > 0.0                           # [N, N] (hoisted, resident)

    # per-head edge embedding (lin_edge fused in): [Hb, E, C]
    ea = ea_ref[...].astype(_BF16)
    e = jnp.stack([jnp.dot(ea, we_ref[h].astype(_BF16),
                           preferred_element_type=jnp.float32)
                   for h in range(hb)], axis=0)
    e_b = e.astype(_BF16)

    base = jnp.einsum('hnc,hmc->hnm', q, k,
                      preferred_element_type=jnp.float32)          # [Hb, N, N]
    pqe = jnp.einsum('hnc,hec->hne', q, e_b,
                     preferred_element_type=jnp.float32)           # [Hb, N, E]
    t = (dinc[None] * pqe).astype(_BF16).reshape(hb * n, e_cnt)
    extra = lax.dot_general(t, sinc, (((1,), (1,)), ((), ())),
                            preferred_element_type=jnp.float32
                            ).reshape(hb, n, n)                    # [Hb, N, N]

    s = base + extra
    s = jnp.where(valid[None], s, _MASK_NEG)
    m = jnp.max(s, axis=-1, keepdims=True)
    p = jnp.exp(s - m) * valid[None].astype(jnp.float32)
    denom = jnp.sum(p, axis=-1, keepdims=True)
    inv = pl.reciprocal(jnp.where(denom > 0.0, denom, 1.0), approx=True)
    alpha = p * inv                                                # [Hb, N, N]
    alpha_b = alpha.astype(_BF16)

    out = jnp.einsum('hnm,hmc->hnc', alpha_b, v,
                     preferred_element_type=jnp.float32)           # [Hb, N, C]
    ae = jnp.dot(alpha.reshape(hb * n, n).astype(_BF16), sinc,
                 preferred_element_type=jnp.float32).reshape(hb, n, e_cnt)
    out = out + jnp.einsum('hne,hec->hnc', (dinc[None] * ae).astype(_BF16),
                           e_b, preferred_element_type=jnp.float32)
    o_ref[...] = out.astype(o_ref.dtype)


def graph_attention(q, k, v, edge_attr, we_heads, adj, dinc, sinc, *,
                    scale, head_block):
    H, N, C = q.shape
    E, Ed = edge_attr.shape
    hb = head_block
    assert H % hb == 0
    cost = pl.CostEstimate(
        flops=int(H * (4 * N * N * C + 4 * N * N * E + 4 * N * E * C
                       + 2 * E * Ed * C)),
        transcendentals=int(H * N * N),
        bytes_accessed=int(4 * (4 * H * N * C + E * Ed + H * Ed * C)
                           + 2 * (2 * N * E + N * N)),
    )
    # TODO(synk): for large N/E add q-tile / edge-tile grid axes (flash-style
    # online softmax, E-chunked incidence) so the whole graph is never
    # resident; trigger at roughly half the N/E on v7x (64 MiB VMEM).
    return pl.pallas_call(
        functools.partial(_graph_attn_kernel, scale=scale),
        out_shape=jax.ShapeDtypeStruct((H, N, C), jnp.float32),
        grid=(H // hb,),
        in_specs=[
            pl.BlockSpec((hb, N, C), lambda g: (g, 0, 0)),    # q
            pl.BlockSpec((hb, N, C), lambda g: (g, 0, 0)),    # k
            pl.BlockSpec((hb, N, C), lambda g: (g, 0, 0)),    # v
            pl.BlockSpec((E, Ed), lambda g: (0, 0)),          # edge_attr
            pl.BlockSpec((hb, Ed, C), lambda g: (g, 0, 0)),   # lin_edge per head
            pl.BlockSpec((N, N), lambda g: (0, 0)),           # adjacency mask (resident)
            pl.BlockSpec((N, E), lambda g: (0, 0)),           # dst incidence (resident)
            pl.BlockSpec((N, E), lambda g: (0, 0)),           # src incidence (resident)
        ],
        out_specs=pl.BlockSpec((hb, N, C), lambda g: (g, 0, 0)),
        compiler_params=pltpu.CompilerParams(
            dimension_semantics=("parallel",),
            vmem_limit_bytes=_VMEM_LIMIT),
        cost_estimate=cost,
    )(q, k, v, edge_attr, we_heads, adj, dinc, sinc)


# --------------------------------------------------------------------------
# Kernel 3: global multi-head attention over the dense batch
#   gridded over graphs only; heads handled inside; lane-dense [S, C] output
# --------------------------------------------------------------------------
def _mha_kernel(x_ref, w_ref, b_ref, mask_ref, o_ref, *, heads, scale):
    S, C = x_ref.shape
    Dh = C // heads
    x = x_ref[...].astype(_BF16)
    qkv = jnp.dot(x, w_ref[...].astype(_BF16),
                  preferred_element_type=jnp.float32) + b_ref[...]      # [S, 3C]
    mask = mask_ref[...] > 0.0                                          # [1, S]
    outs = []
    for h in range(heads):                       # small static head loop
        q = (qkv[:, h * Dh:(h + 1) * Dh] * scale).astype(_BF16)
        k = qkv[:, C + h * Dh:C + (h + 1) * Dh].astype(_BF16)
        v = qkv[:, 2 * C + h * Dh:2 * C + (h + 1) * Dh].astype(_BF16)
        s = lax.dot_general(q, k, (((1,), (1,)), ((), ())),
                            preferred_element_type=jnp.float32)         # [S, S]
        s = jnp.where(mask, s, _MASK_NEG)
        m = jnp.max(s, axis=-1, keepdims=True)
        p = jnp.exp(s - m)
        inv = pl.reciprocal(jnp.sum(p, axis=-1, keepdims=True), approx=True)
        outs.append(jnp.dot((p * inv).astype(_BF16), v,
                            preferred_element_type=jnp.float32))         # [S, Dh]
    o_ref[...] = jnp.concatenate(outs, axis=-1).astype(o_ref.dtype)      # [S, C]


def global_mha(x_dense, w_in, b_in, mask, *, heads, scale):
    B, S, C = x_dense.shape
    Dh = C // heads
    cost = pl.CostEstimate(
        flops=int(B * (6 * S * C * C + 4 * heads * S * S * Dh)),
        transcendentals=int(B * heads * S * S),
        bytes_accessed=int(4 * (2 * B * S * C + 3 * C * C + B * S)),
    )
    return pl.pallas_call(
        functools.partial(_mha_kernel, heads=heads, scale=scale),
        out_shape=jax.ShapeDtypeStruct((B, S, C), jnp.float32),
        grid=(B,),
        in_specs=[
            pl.BlockSpec((None, S, C), lambda b: (b, 0, 0)),   # dense node feats
            pl.BlockSpec((C, 3 * C), lambda b: (0, 0)),        # in_proj weight
            pl.BlockSpec((1, 3 * C), lambda b: (0, 0)),        # in_proj bias
            pl.BlockSpec((None, 1, S), lambda b: (b, 0, 0)),   # key-padding mask
        ],
        out_specs=pl.BlockSpec((None, S, C), lambda b: (b, 0, 0)),
        compiler_params=pltpu.CompilerParams(
            dimension_semantics=("parallel",),
            vmem_limit_bytes=_VMEM_LIMIT),
        cost_estimate=cost,
    )(x_dense, w_in, b_in, mask)


# --------------------------------------------------------------------------
# Kernel 4: fused elementwise / norm tail
#   beta-mix -> Linear -> +x -> GraphNorm    (local branch)
#   out-proj -> +x -> GraphNorm              (global branch)
#   sum -> MLP -> residual -> GraphNorm      (final)
# --------------------------------------------------------------------------
def _fused_tail_kernel(agg_ref, skip_ref, wba_ref, wbb_ref,
                       linw_ref, linb_ref, attn_ref, ow_ref, ob_ref, x_ref,
                       w1_ref, b1_ref, w2_ref, b2_ref,
                       bnw_ref, bnb_ref, bnms_ref, o_ref, *, eps):
    x = x_ref[...]
    bn_w = bnw_ref[...]
    bn_b = bnb_ref[...]
    bn_ms = bnms_ref[...]

    def graph_norm(h):
        # GraphNorm exactly as the module calls it: self.bn(h) without a batch
        # vector -> statistics over the whole node set.
        # TODO(synk): needs a two-pass accumulate scheme once this kernel gets
        # an N-tile grid for large graphs.
        mean = jnp.mean(h, axis=0, keepdims=True)
        centered = h - mean * bn_ms
        var = jnp.mean(centered * centered, axis=0, keepdims=True)
        return bn_w * centered * lax.rsqrt(var + eps) + bn_b

    # ---- local branch --------------------------------------------------------
    agg = agg_ref[...]
    skip = skip_ref[...]
    # folded beta weights: wb_a = wb1 + wb3, wb_b = wb2 - wb3
    logit = jnp.sum(agg * wba_ref[...] + skip * wbb_ref[...],
                    axis=-1, keepdims=True)
    beta = jax.nn.sigmoid(logit)
    conv_out = beta * skip + (1.0 - beta) * agg
    h_local = jnp.dot(conv_out, linw_ref[...],
                      preferred_element_type=jnp.float32) + linb_ref[...]
    h_local = graph_norm(h_local + x)

    # ---- global branch -------------------------------------------------------
    h_glob = jnp.dot(attn_ref[...], ow_ref[...],
                     preferred_element_type=jnp.float32) + ob_ref[...]
    h_glob = graph_norm(h_glob + x)

    # ---- combine, MLP, final norm --------------------------------------------
    out = h_local + h_glob
    hidden = jnp.maximum(
        jnp.dot(out, w1_ref[...], preferred_element_type=jnp.float32)
        + b1_ref[...], 0.0)
    mlp = jnp.dot(hidden, w2_ref[...],
                  preferred_element_type=jnp.float32) + b2_ref[...]
    o_ref[...] = graph_norm(out + mlp).astype(o_ref.dtype)


def fused_tail(agg, skip, wba, wbb, lin_w, lin_b, attn_nodes, ow, ob, x,
               w1, b1, w2, b2, bn_w, bn_b, bn_ms, eps=1e-5):
    kern = functools.partial(_fused_tail_kernel, eps=eps)
    return _vmem_call(kern, jax.ShapeDtypeStruct(x.shape, jnp.float32), 17)(
        agg, skip, wba, wbb, lin_w, lin_b, attn_nodes, ow, ob, x,
        w1, b1, w2, b2, bn_w, bn_b, bn_ms)


# --------------------------------------------------------------------------
# Parameters (deterministic init; shapes follow the module's __init__)
# --------------------------------------------------------------------------
def init_params(key, C, H, Ed):
    HC = H * C
    keys = jax.random.split(key, 24)

    def dense(k, fin, fout):
        return (1.0 / math.sqrt(fin)) * jax.random.normal(k, (fin, fout), jnp.float32)

    def bias(k, fout):
        return 0.1 * jax.random.normal(k, (fout,), jnp.float32)

    p = {}
    # TransformerConv(channels, channels, heads, edge_dim, beta=True)
    p["conv_wq"], p["conv_bq"] = dense(keys[0], C, HC), bias(keys[1], HC)
    p["conv_wk"], p["conv_bk"] = dense(keys[2], C, HC), bias(keys[3], HC)
    p["conv_wv"], p["conv_bv"] = dense(keys[4], C, HC), bias(keys[5], HC)
    p["conv_we"] = dense(keys[6], Ed, HC)                      # lin_edge (no bias)
    p["conv_wskip"], p["conv_bskip"] = dense(keys[7], C, HC), bias(keys[8], HC)
    wbeta = (1.0 / math.sqrt(3 * HC)) * jax.random.normal(keys[9], (3 * HC,), jnp.float32)
    p["conv_wbeta1"] = wbeta[:HC].reshape(1, HC)
    p["conv_wbeta2"] = wbeta[HC:2 * HC].reshape(1, HC)
    p["conv_wbeta3"] = wbeta[2 * HC:].reshape(1, HC)
    # Linear(channels*heads, channels)
    p["lin_w"], p["lin_b"] = dense(keys[10], HC, C), bias(keys[11], C)
    # MultiheadAttention(channels, heads)
    p["attn_in_w"], p["attn_in_b"] = dense(keys[12], C, 3 * C), bias(keys[13], 3 * C)
    p["attn_out_w"], p["attn_out_b"] = dense(keys[14], C, C), bias(keys[15], C)
    # MLP: Linear(C, 2C) -> relu -> Linear(2C, C)
    p["mlp_w1"], p["mlp_b1"] = dense(keys[16], C, 2 * C), bias(keys[17], 2 * C)
    p["mlp_w2"], p["mlp_b2"] = dense(keys[18], 2 * C, C), bias(keys[19], C)
    # GraphNorm(channels): default init
    p["bn_w"] = jnp.ones((C,), jnp.float32)
    p["bn_b"] = jnp.zeros((C,), jnp.float32)
    p["bn_ms"] = jnp.ones((C,), jnp.float32)
    return p


def prepare_params(p, *, C, H, Ed):
    """One-time weight prep (concat, folding, head-major layout) outside the
    per-forward path."""
    HC = H * C
    out = {}
    out["proj_w"] = jnp.concatenate([p["conv_wq"], p["conv_wk"],
                                     p["conv_wv"], p["conv_wskip"]], axis=1)
    out["proj_b"] = jnp.concatenate([p["conv_bq"], p["conv_bk"],
                                     p["conv_bv"], p["conv_bskip"]]
                                    ).reshape(1, 4 * HC)
    out["conv_we_heads"] = jnp.transpose(p["conv_we"].reshape(Ed, H, C), (1, 0, 2))
    out["conv_wbeta_a"] = p["conv_wbeta1"] + p["conv_wbeta3"]      # folded
    out["conv_wbeta_b"] = p["conv_wbeta2"] - p["conv_wbeta3"]
    out["lin_w"] = p["lin_w"]
    out["lin_b"] = p["lin_b"].reshape(1, C)
    out["attn_in_w"] = p["attn_in_w"]
    out["attn_in_b"] = p["attn_in_b"].reshape(1, 3 * C)
    out["attn_out_w"] = p["attn_out_w"]
    out["attn_out_b"] = p["attn_out_b"].reshape(1, C)
    out["mlp_w1"] = p["mlp_w1"]
    out["mlp_b1"] = p["mlp_b1"].reshape(1, 2 * C)
    out["mlp_w2"] = p["mlp_w2"]
    out["mlp_b2"] = p["mlp_b2"].reshape(1, C)
    out["bn_w"] = p["bn_w"].reshape(1, C)
    out["bn_b"] = p["bn_b"].reshape(1, C)
    out["bn_ms"] = p["bn_ms"].reshape(1, C)
    return out


# --------------------------------------------------------------------------
# GPSConv forward
# --------------------------------------------------------------------------
def gps_conv_forward(params, x, edge_index, edge_attr, batch_np, *, C, H):
    N = x.shape[0]
    HC = H * C
    Dh = C // H
    E, Ed = edge_attr.shape

    # ---- fused q/k/v/skip projection (one matmul, four outputs) -------------
    q, k, v, skip = fused_projection(x, params["proj_w"], params["proj_b"], HC)

    def to_heads(t):                                          # [N, HC] -> [H, N, C]
        return jnp.transpose(t.reshape(N, H, C), (1, 0, 2))

    # ---- local MPNN: TransformerConv(beta=True, edge_dim) -------------------
    src, dst = edge_index[0], edge_index[1]
    node_ids = jnp.arange(N)
    dinc = (dst[None, :] == node_ids[:, None]).astype(_BF16)   # [N, E]
    sinc = (src[None, :] == node_ids[:, None]).astype(_BF16)   # [N, E]
    # head-independent adjacency mask, computed ONCE (hoisted out of the grid)
    adj = jnp.zeros((N, N), _BF16).at[dst, src].set(1.0)

    agg = graph_attention(to_heads(q), to_heads(k), to_heads(v), edge_attr,
                          params["conv_we_heads"], adj, dinc, sinc,
                          scale=1.0 / math.sqrt(C),
                          head_block=_head_block(H))          # [H, N, C]
    # TODO(synk): pack per-head outputs lane-dense ([N, Hb*C]) inside the kernel
    # once Hb*C >= 128 to remove this XLA transpose.
    agg = jnp.transpose(agg, (1, 0, 2)).reshape(N, HC)

    # ---- global attention over the dense batch ------------------------------
    batch_host = np.asarray(batch_np)
    B = int(batch_host.max()) + 1
    counts = np.bincount(batch_host, minlength=B)
    S = max(8, int(-(-int(counts.max()) // 8) * 8))           # pad seq to sublane x8
    order = np.argsort(batch_host, kind="stable")             # vectorized cumcount
    starts = np.cumsum(counts) - counts
    pos = np.empty(N, dtype=np.int64)
    pos[order] = np.arange(N) - np.repeat(starts, counts)
    flat_idx = jnp.asarray((batch_host.astype(np.int64) * S + pos).astype(np.int32))

    x_dense = jnp.zeros((B * S, C), jnp.float32).at[flat_idx].set(x).reshape(B, S, C)
    mask = jnp.zeros((B * S,), jnp.float32).at[flat_idx].set(1.0).reshape(B, 1, S)
    # TODO(synk): the to_dense_batch scatter + node gather could move into
    # Pallas via scalar-prefetched indices; negligible at these sizes.

    attn = global_mha(x_dense, params["attn_in_w"], params["attn_in_b"], mask,
                      heads=H, scale=1.0 / math.sqrt(Dh))     # [B, S, C] lane-dense
    attn_nodes = attn.reshape(B * S, C)[flat_idx]             # h = h[mask]

    # ---- fused elementwise / norm tail (single kernel) ----------------------
    out = fused_tail(
        agg, skip,
        params["conv_wbeta_a"], params["conv_wbeta_b"],
        params["lin_w"], params["lin_b"],
        attn_nodes, params["attn_out_w"], params["attn_out_b"],
        x,
        params["mlp_w1"], params["mlp_b1"],
        params["mlp_w2"], params["mlp_b2"],
        params["bn_w"], params["bn_b"], params["bn_ms"])
    return out


# --------------------------------------------------------------------------
if __name__ == "__main__":
    C, H, Ed = 8, 2, 4                       # channels, heads, edge_dim
    nodes_per_graph = [6, 6]
    N = sum(nodes_per_graph)

    # deterministic graph: a bidirectional ring inside each graph
    src_list, dst_list, batch_list = [], [], []
    base = 0
    for g, n in enumerate(nodes_per_graph):
        for i in range(n):
            j = (i + 1) % n
            src_list += [base + i, base + j]
            dst_list += [base + j, base + i]
        batch_list += [g] * n
        base += n
    edge_index = np.array([src_list, dst_list], dtype=np.int32)
    batch_np = np.array(batch_list, dtype=np.int32)
    E = edge_index.shape[1]

    key = jax.random.PRNGKey(0)
    kx, ke, kp = jax.random.split(key, 3)
    x = jax.random.normal(kx, (N, C), jnp.float32)
    edge_attr = jax.random.normal(ke, (E, Ed), jnp.float32)

    params = prepare_params(init_params(kp, C, H, Ed), C=C, H=H, Ed=Ed)

    out = gps_conv_forward(params, x, jnp.asarray(edge_index), edge_attr,
                           batch_np, C=C, H=H)
    out = jax.block_until_ready(out)
    assert out.shape == (N, C)
    assert bool(jnp.all(jnp.isfinite(out)))
    print("KERNEL_OK")
</pallas_src>

<mosaic_0001>
module attributes {stable_mosaic.version = 11 : i64} {
  func.func @_fused_proj_kernel(%arg0: memref<12x8xf32, #tpu.memory_space<vmem>>, %arg1: memref<8x64xf32, #tpu.memory_space<vmem>>, %arg2: memref<1x64xf32, #tpu.memory_space<vmem>>, %arg3: memref<12x16xf32, #tpu.memory_space<vmem>>, %arg4: memref<12x16xf32, #tpu.memory_space<vmem>>, %arg5: memref<12x16xf32, #tpu.memory_space<vmem>>, %arg6: memref<12x16xf32, #tpu.memory_space<vmem>>) attributes {dimension_semantics = [], scalar_prefetch = 0 : i64, scratch_operands = 0 : i64, tpu.core_type = #tpu.core_type<tc>} {
    %c0 = arith.constant 0 : index
    %c0_0 = arith.constant 0 : index
    %0 = vector.load %arg0[%c0, %c0_0] : memref<12x8xf32, #tpu.memory_space<vmem>>, vector<12x8xf32>
    %1 = arith.truncf %0 : vector<12x8xf32> to vector<12x8xbf16>
    %c0_1 = arith.constant 0 : index
    %c0_2 = arith.constant 0 : index
    %2 = vector.load %arg1[%c0_1, %c0_2] : memref<8x64xf32, #tpu.memory_space<vmem>>, vector<8x64xf32>
    %3 = arith.truncf %2 : vector<8x64xf32> to vector<8x64xbf16>
    %cst = arith.constant dense<0.000000e+00> : vector<12x64xf32>
    %4 = tpu.matmul %1, %3, %cst {dimension_numbers = #tpu.dot_dimension_numbers<[1], [0], [0], [1], [0, 0, 1, 1], [], []>} : vector<12x8xbf16>, vector<8x64xbf16>, vector<12x64xf32> -> vector<12x64xf32>
    %c0_3 = arith.constant 0 : index
    %c0_4 = arith.constant 0 : index
    %5 = vector.load %arg2[%c0_3, %c0_4] : memref<1x64xf32, #tpu.memory_space<vmem>>, vector<1x64xf32>
    %6 = vector.broadcast %5 : vector<1x64xf32> to vector<12x64xf32>
    %7 = arith.addf %4, %6 : vector<12x64xf32>
    %8 = vector.extract_strided_slice %7 {offsets = [0, 0], sizes = [12, 16], strides = [1, 1]} : vector<12x64xf32> to vector<12x16xf32>
    %c0_5 = arith.constant 0 : index
    %c0_6 = arith.constant 0 : index
    %9 = vector.load %arg3[%c0_5, %c0_6] : memref<12x16xf32, #tpu.memory_space<vmem>>, vector<12x16xf32>
    tpu.vector_store %arg3[%c0_5, %c0_6], %8 {strides = array<i32>} : memref<12x16xf32, #tpu.memory_space<vmem>>, vector<12x16xf32>,
    %10 = vector.extract_strided_slice %7 {offsets = [0, 16], sizes = [12, 16], strides = [1, 1]} : vector<12x64xf32> to vector<12x16xf32>
    %c0_7 = arith.constant 0 : index
    %c0_8 = arith.constant 0 : index
    %11 = vector.load %arg4[%c0_7, %c0_8] : memref<12x16xf32, #tpu.memory_space<vmem>>, vector<12x16xf32>
    tpu.vector_store %arg4[%c0_7, %c0_8], %10 {strides = array<i32>} : memref<12x16xf32, #tpu.memory_space<vmem>>, vector<12x16xf32>,
    %12 = vector.extract_strided_slice %7 {offsets = [0, 32], sizes = [12, 16], strides = [1, 1]} : vector<12x64xf32> to vector<12x16xf32>
    %c0_9 = arith.constant 0 : index
    %c0_10 = arith.constant 0 : index
    %13 = vector.load %arg5[%c0_9, %c0_10] : memref<12x16xf32, #tpu.memory_space<vmem>>, vector<12x16xf32>
    tpu.vector_store %arg5[%c0_9, %c0_10], %12 {strides = array<i32>} : memref<12x16xf32, #tpu.memory_space<vmem>>, vector<12x16xf32>,
    %14 = vector.extract_strided_slice %7 {offsets = [0, 48], sizes = [12, 16], strides = [1, 1]} : vector<12x64xf32> to vector<12x16xf32>
    %c0_11 = arith.constant 0 : index
    %c0_12 = arith.constant 0 : index
    %15 = vector.load %arg6[%c0_11, %c0_12] : memref<12x16xf32, #tpu.memory_space<vmem>>, vector<12x16xf32>
    tpu.vector_store %arg6[%c0_11, %c0_12], %14 {strides = array<i32>} : memref<12x16xf32, #tpu.memory_space<vmem>>, vector<12x16xf32>,
    return
  }
}

</mosaic_0001>

<bundles_post_ra>
// kernel: tpu_custom_call.1
= control target key start
LH: loop header
LB: loop body
LE: loop exit
PB: predicated region body
PF: predicated region fallthrough
CT: control target
= control target key end

     0   :  { %12 = vsyncpa [#allocation3], 0  ;;  %s355_s0 = inlined_call_operand.vmem [shape: f32[12,8], index: 0, kind: input, shape index: {}]   ;;  %s356_s1 = inlined_call_operand.vmem [shape: f32[8,64], index: 1, kind: input, shape index: {}]   ;;  %s357_s2 = inlined_call_operand.vmem [shape: f32[1,64], index: 2, kind: input, shape index: {}]   ;;  %s358_s3 = inlined_call_operand.hbm [shape: f32[12,16], index: 3, kind: output, shape index: {0}]   ;;  %s359_s4 = inlined_call_operand.hbm [shape: f32[12,16], index: 4, kind: output, shape index: {1}]   ;;  %s360_s5 = inlined_call_operand.hbm [shape: f32[12,16], index: 5, kind: output, shape index: {2}]   ;;  %s361_s6 = inlined_call_operand.hbm [shape: f32[12,16], index: 6, kind: output, shape index: {3}]  }
   0x1   :  { %13 = vsyncpa [#allocation5], 0  ;;  %v25_v0 = vld [vmem:[%s356_s1] sm:$0xff]  ;;  %vm35_vm0 = vcmask 1043456   ;;  %v23_v2 = vld [vmem:[%s355_s0 + $0x8] sm:$0xf] }
   0x2   :  { %v22_v1 = vld [vmem:[%s355_s0] sm:$0xff]  ;;  %v26_v3 = vpack.c.bf16 %v25_v0, %v25_v0 }
   0x3   :  { %14 = vsyncpa [#allocation8], 0  ;;  %v24_v5 = vpack.c.bf16 %v23_v2, %v22_v1  ;;  %vm31_vm1 = vcmask 64512   ;;  %v164_v6 = vld [vmem:[%s357_s2] ss:$0 sm:$0xff]  ;;  %vm53_vm2 = vcmask 130048  }
   0x4   :  { %v37_v4 = vsel %vm35_vm0, %v26_v3, 0  ;;  %s267_s1 = smov 80   ;;  %s268_s29 = smov 96   ;;  %vm55_vm3 = vcmask 125952  }
   0x5   :  { %46 = vmatpush.bf16.msra.mxu0 %v37_v4  ;;  %s269_s0 = smov 112   ;;  %s270_s30 = smov [#allocation2]  }
   0x6   :  { %s87_s7 = sshll.u32 %s270_s30, 4  ;;  %s89_s10 = sshll.u32 %s358_s3, 4  ;;  %s88_s7 = int_to_ptr.vmem [resolvable:$true] %s87_s7  ;;  %s90_s10 = int_to_ptr.hbm [resolvable:$true] %s89_s10 }
   0x7   :  { %s271_s2 = smov 128   ;;  %s272_s11 = smov 8  }
   0x8   :  { %154 = vmatmul.msk.bf16.vlgmr.msra.gmra.mxu0 %vm31_vm1, %v24_v5  ;;  %s273_s3 = smov [#allocation7]   ;;  %s128_s15 = sshll.u32 %s361_s6, 4  ;;  %s129_s15 = int_to_ptr.hbm [resolvable:$true] %s128_s15 }
   0x9   :  { %s126_s12 = sshll.u32 %s273_s3, 4  ;;  %s274_s16 = smov [#allocation4]   ;;  %s127_s12 = int_to_ptr.vmem [resolvable:$true] %s126_s12 }
   0xa   :  { %s100_s17 = sshll.u32 %s274_s16, 4  ;;  %s102_s6 = sshll.u32 %s359_s4, 4  ;;  %s101_s17 = int_to_ptr.vmem [resolvable:$true] %s100_s17  ;;  %s103_s6 = int_to_ptr.hbm [resolvable:$true] %s102_s6 }
   0xb   :  { %s275_s20 = smov [#allocation6]   ;;  %s115_s24 = sshll.u32 %s360_s5, 4  ;;  %s116_s24 = int_to_ptr.hbm [resolvable:$true] %s115_s24 }
   0xc   :  { %s113_s21 = sshll.u32 %s275_s20, 4  ;;  %s114_s21 = int_to_ptr.vmem [resolvable:$true] %s113_s21 }
  0x85   :  { %v48_v7 = vpop.f32.mrf.mxu0 }
  0x86   :  { %v49_v8 = vadd.f32 %v164_v6, %v48_v7 }
  0x88   :  { %75 = vrot.lane.b32.xlu2 %v49_v8, %s267_s1  ;;  %67 = vrot.lane.b32.xlu1 %v49_v8, %s268_s29  ;;  %54 = vst.msk [vmem:[#allocation2] sm:$0xff] %vm53_vm2, %v49_v8 }
  0x89   :  { %59 = vrot.lane.b32.xlu0 %v49_v8, %s269_s0 }
  0x8d   :  { %v50_v9 = vpop.f32.mrf.mxu0 }
  0x8e   :  { %v51_v10 = vadd.f32 %v164_v6, %v50_v9 }
  0x90   :  { %77 = vrot.lane.b32.xlu2 %v51_v10, %s267_s1  ;;  %69 = vrot.lane.b32.xlu1 %v51_v10, %s268_s29  ;;  %56 = vst.msk [vmem:[#allocation2 + $0x8] sm:$0xf] %vm55_vm3, %v51_v10 }
  0x91   :  { %61 = vrot.lane.b32.xlu0 %v51_v10, %s269_s0 }
  0x92   :  { %95 = dma.vmem_to_hbm [thread:$0]  %s88_s7, 256, %s90_s10, [#allocation3], %s271_s2, %s271_s2, %s272_s11  }
  0xe2   :  { %v76_v11 = vpop.permute.xlu2 %75 }
  0xe3   :  { %81 = vst.msk [vmem:[#allocation7] sm:$0xff] %vm53_vm2, %v76_v11 }
  0xea   :  { %v78_v12 = vpop.permute.xlu2 %77 }
  0xeb   :  { %82 = vst.msk [vmem:[#allocation7 + $0x8] sm:$0xf] %vm55_vm3, %v78_v12 }
  0xec   :  { %134 = dma.vmem_to_hbm [thread:$0]  %s127_s12, 256, %s129_s15, [#allocation8], %s271_s2, %s271_s2, %s272_s11  }
  0xfa   :  { %v68_v13 = vpop.permute.xlu1 %67 }
  0xfb   :  { %73 = vst.msk [vmem:[#allocation6] sm:$0xff] %vm53_vm2, %v68_v13  ;;  %v60_v14 = vpop.permute.xlu0 %59 }
  0xfc   :  { %65 = vst.msk [vmem:[#allocation4] sm:$0xff] %vm53_vm2, %v60_v14 }
 0x102   :  { %v70_v15 = vpop.permute.xlu1 %69 }
 0x103   :  { %74 = vst.msk [vmem:[#allocation6 + $0x8] sm:$0xf] %vm55_vm3, %v70_v15  ;;  %v62_v16 = vpop.permute.xlu0 %61 }
 0x104   :  { %66 = vst.msk [vmem:[#allocation4 + $0x8] sm:$0xf] %vm55_vm3, %v62_v16 }
 0x105   :  { %108 = dma.vmem_to_hbm [thread:$0]  %s101_s17, 256, %s103_s6, [#allocation5], %s271_s2, %s271_s2, %s272_s11  }
 0x106   :  { %121 = dma.vmem_to_hbm [thread:$0]  %s114_s21, 256, %s116_s24, [#allocation5], %s271_s2, %s271_s2, %s272_s11  }
 0x107   :  { %261 = dma.done.wait [#allocation3], 256  }
 0x108   :  { %262 = vsyncadd [#allocation3], 4294967040 }
 0x109   :  { %263 = dma.done.wait [#allocation5], 512  }
 0x10a   :  { %264 = vsyncadd [#allocation5], 4294966784 }
 0x10b   :  { %265 = dma.done.wait [#allocation8], 256  }
 0x10c   :  { %266 = vsyncadd [#allocation8], 4294967040 }
 0x10d   :  { %151 = vsyncpa [#allocation3], 1 }
 0x10e   :  { %152 = vsyncpa [#allocation5], 1 }
 0x10f   :  { %153 = vsyncpa [#allocation8], 1 }

</bundles_post_ra>
